<compile_context>
chip_gen: v5e
topology: v5e:2x2
jax: 0.10.0
libtpu: 0.0.40
codegen_flags: <defaults>
</compile_context>

<pallas_src>
import functools

import jax
import jax.numpy as jnp
from jax.experimental import pallas as pl
from jax.experimental.pallas import tpu as pltpu

LANE = 128
_VMEM_BUDGET = 24 << 20     # conservative per-kernel working-set budget
_VMEM_CAP = 64 << 20        # never request beyond v7x physical VMEM per TC


def _round_up(x, m):
    return -(-x // m) * m


# ---------------------------------------------------------------------------
# Kernel 1: ConvPool (k x k, stride k, no bias/bn/relu) as a tiled matmul over
# space-to-depth patches.  Patches are non-overlapping, so the wrapper-side
# space-to-depth is pure layout plumbing (no byte inflation).
# ---------------------------------------------------------------------------
def _convpool_kernel(x_ref, w_ref, o_ref):
    o_ref[...] = jnp.dot(x_ref[...], w_ref[...],
                         preferred_element_type=jnp.float32).astype(o_ref.dtype)


def _pick_block_rows(N, bytes_per_row, target=512):
    """Largest row tile (multiple of 8, <= target) that divides N, fits the
    VMEM budget when double-buffered, and preferably yields an even, >=2 step
    grid (v7x has two TensorCores sharing the parallel axis)."""
    def fits(br):
        return 2 * br * bytes_per_row <= _VMEM_BUDGET

    cands = [d for d in range(8, min(target, N) + 1, 8) if N % d == 0 and fits(d)]
    if cands:
        multi = [d for d in cands if N // d >= 2]
        even = [d for d in multi if (N // d) % 2 == 0]
        pool = even or multi or cands
        return max(pool), N
    # Ragged N: fall back to padding (rare; B*Ho*Wo is a multiple of Wo).
    br = max(8, min(target, _round_up(max(N // 2, 1), 8)))
    while br > 8 and not fits(br):
        br -= 8
    return br, _round_up(N, br)


def convpool_matmul(x2d, w, *, out_dtype):
    """out[n, c] = sum_k x2d[n, k] * w[k, c]   (no bias / BN / ReLU)."""
    N, K = x2d.shape
    Cp = w.shape[1]
    isz = max(x2d.dtype.itemsize, jnp.dtype(out_dtype).itemsize)
    br, Np = _pick_block_rows(N, (K + Cp) * isz)
    if Np != N:
        x2d = jnp.pad(x2d, ((0, Np - N), (0, 0)))
    n_blocks = Np // br

    vmem_limit = int(min(_VMEM_CAP,
                         max(32 << 20,
                             2 * br * (K + Cp) * isz + 2 * K * Cp * isz + (2 << 20))))
    cost = pl.CostEstimate(
        flops=2 * Np * K * Cp, transcendentals=0,
        bytes_accessed=(x2d.size * x2d.dtype.itemsize + w.size * w.dtype.itemsize
                        + Np * Cp * jnp.dtype(out_dtype).itemsize))

    out = pl.pallas_call(
        _convpool_kernel,
        out_shape=jax.ShapeDtypeStruct((Np, Cp), out_dtype),
        grid=(n_blocks,),
        in_specs=[pl.BlockSpec((br, K), lambda i: (i, 0)),    # activation row tile
                  pl.BlockSpec((K, Cp), lambda i: (0, 0))],   # weights (resident)
        out_specs=pl.BlockSpec((br, Cp), lambda i: (i, 0)),   # lane-dense store
        compiler_params=pltpu.CompilerParams(
            dimension_semantics=("parallel",),
            vmem_limit_bytes=vmem_limit),
        cost_estimate=cost,
    )(x2d, w)
    return out if Np == N else out[:N]


# ---------------------------------------------------------------------------
# Kernel 2: fused Residual_Block.
#   in-kernel im2col (9 shifted taps per conv), f32 VMEM accumulator,
#   BN scale pre-folded into the weights, intermediate t kept in a
#   zero-haloed VMEM scratch, residual read from the interior of the padded
#   activation block, ReLU fused into the stores.
# ---------------------------------------------------------------------------
def _resblock_kernel(yp_ref, w1_ref, s1_ref, w2_ref, s2_ref, o_ref,
                     acc_ref, tpad_ref, *, Ho, Wo):
    Cp = o_ref.shape[-1]

    # ---- conv1: 9 MXU taps accumulated in f32, + shift (bias+BN), ReLU ------
    acc_ref[...] = jnp.zeros_like(acc_ref)
    for t in range(9):
        di, dj = divmod(t, 3)
        win = yp_ref[di:di + Ho, dj:dj + Wo, :].reshape(Ho * Wo, Cp)
        acc_ref[...] += jnp.dot(win, w1_ref[t],
                                preferred_element_type=jnp.float32)
    t1 = jnp.maximum(acc_ref[...] + s1_ref[...], 0.0)

    # keep t in VMEM with a zero halo; it never touches HBM
    tpad_ref[...] = jnp.zeros_like(tpad_ref)
    tpad_ref[1:1 + Ho, 1:1 + Wo, :] = t1.reshape(Ho, Wo, Cp).astype(tpad_ref.dtype)

    # ---- conv2: 9 MXU taps, + shift, + residual (interior of yp), ReLU ------
    acc_ref[...] = jnp.zeros_like(acc_ref)
    for t in range(9):
        di, dj = divmod(t, 3)
        win = tpad_ref[di:di + Ho, dj:dj + Wo, :].reshape(Ho * Wo, Cp)
        acc_ref[...] += jnp.dot(win, w2_ref[t],
                                preferred_element_type=jnp.float32)
    res = yp_ref[1:1 + Ho, 1:1 + Wo, :].reshape(Ho * Wo, Cp).astype(jnp.float32)
    z = jnp.maximum(acc_ref[...] + s2_ref[...] + res, 0.0)
    o_ref[...] = z.reshape(Ho, Wo, Cp).astype(o_ref.dtype)


def residual_block_fused(yp, w1t, s1, w2t, s2, *, out_dtype):
    """yp: (B, Ho+2, Wo+2, Cp) spatially zero-padded activations (channel-padded
    to a multiple of 128).  Returns (B, Ho, Wo, Cp)."""
    B, Hp, Wp, Cp = yp.shape
    Ho, Wo = Hp - 2, Wp - 2
    isz = yp.dtype.itemsize
    out_isz = jnp.dtype(out_dtype).itemsize
    w_bytes = (w1t.size + w2t.size) * w1t.dtype.itemsize

    est = (2 * Hp * Wp * Cp * isz              # input block (double-buffered)
           + 2 * Ho * Wo * Cp * out_isz        # output block (double-buffered)
           + 2 * w_bytes + 4 * 2 * Cp * 4      # weights + shifts
           + Ho * Wo * Cp * 4                  # f32 accumulator scratch
           + Hp * Wp * Cp * isz                # haloed t scratch
           + (2 << 20))
    vmem_limit = int(min(_VMEM_CAP, max(32 << 20, est)))
    # TODO(synk): very large (H*W, C) configs need spatial row-banding and
    # weight K-tiling to stay inside v7x's 64 MiB VMEM; not needed here.

    cost = pl.CostEstimate(
        flops=2 * 2 * 9 * B * Ho * Wo * Cp * Cp, transcendentals=0,
        bytes_accessed=(yp.size * isz + 2 * w_bytes + B * Ho * Wo * Cp * out_isz))

    kernel = functools.partial(_resblock_kernel, Ho=Ho, Wo=Wo)
    return pl.pallas_call(
        kernel,
        out_shape=jax.ShapeDtypeStruct((B, Ho, Wo, Cp), out_dtype),
        grid=(B,),
        in_specs=[
            pl.BlockSpec((None, Hp, Wp, Cp), lambda b: (b, 0, 0, 0)),  # padded y
            pl.BlockSpec((9, Cp, Cp), lambda b: (0, 0, 0)),            # w1 taps
            pl.BlockSpec((1, Cp), lambda b: (0, 0)),                   # shift1
            pl.BlockSpec((9, Cp, Cp), lambda b: (0, 0, 0)),            # w2 taps
            pl.BlockSpec((1, Cp), lambda b: (0, 0)),                   # shift2
        ],
        out_specs=pl.BlockSpec((None, Ho, Wo, Cp), lambda b: (b, 0, 0, 0)),
        scratch_shapes=[pltpu.VMEM((Ho * Wo, Cp), jnp.float32),  # f32 accumulator
                        pltpu.VMEM((Hp, Wp, Cp), yp.dtype)],     # t with zero halo
        compiler_params=pltpu.CompilerParams(
            dimension_semantics=("parallel",),
            vmem_limit_bytes=vmem_limit),
        cost_estimate=cost,
    )(yp, w1t, s1, w2t, s2)


# ---------------------------------------------------------------------------
# Wrapper-side layout plumbing (no compute)
# ---------------------------------------------------------------------------
def _space_to_depth(x_nhwc, k):
    B, H, W, C = x_nhwc.shape
    Ho, Wo = H // k, W // k
    x = x_nhwc.reshape(B, Ho, k, Wo, k, C).transpose(0, 1, 3, 2, 4, 5)
    return x.reshape(B * Ho * Wo, k * k * C)


def _conv_w_to_matmul(w_oihw):
    """(Cout, Cin, kh, kw) -> (kh*kw*Cin, Cout), matching (di, dj, ci) patches."""
    Cout = w_oihw.shape[0]
    return jnp.transpose(w_oihw, (2, 3, 1, 0)).reshape(-1, Cout)


def _fold_bn_into_conv(w_oihw, bias, gamma, beta, mean, var, Cp, eps):
    """3x3 conv -> (9, Cp, Cp) weight taps with the BN scale folded in, plus the
    per-channel shift (conv bias + BN shift), zero-padded to Cp lanes."""
    Cout = w_oihw.shape[0]
    scale = gamma / jnp.sqrt(var + eps)
    shift = beta + scale * (bias - mean)
    taps = jnp.transpose(w_oihw, (2, 3, 1, 0)).reshape(9, Cout, Cout)
    taps = taps * scale[None, None, :]
    taps = jnp.pad(taps, ((0, 0), (0, Cp - Cout), (0, Cp - Cout)))
    shift = jnp.pad(shift, (0, Cp - Cout)).reshape(1, Cp)
    return taps, shift.astype(jnp.float32)


# ---------------------------------------------------------------------------
# resnet_down forward
# ---------------------------------------------------------------------------
def resnet_down_forward(x_nchw, p, *, down_factor=2, eps=1e-5,
                        compute_dtype=jnp.bfloat16):
    """x_nchw: (B, Cin, H, W) -> (B, Cout, H//k, W//k).
    compute_dtype feeds the MXU and stores the intermediates (default bf16);
    accumulation and epilogue run in f32 in-kernel; output is x's dtype."""
    k = down_factor
    cdt = jnp.dtype(compute_dtype or x_nchw.dtype)
    x = jnp.transpose(x_nchw, (0, 2, 3, 1))                      # NHWC
    B, H, W, Cin = x.shape
    assert H % k == 0 and W % k == 0
    Ho, Wo = H // k, W // k
    Cout = p['down_w'].shape[0]
    Cp = _round_up(Cout, LANE)       # lane-dense channel count (multiple of 128)

    # --- ConvPool: k x k / stride k, no bias/bn/relu (space-to-depth matmul) --
    x2d = _space_to_depth(x, k).astype(cdt)                 # (B*Ho*Wo, k*k*Cin)
    wd = jnp.pad(_conv_w_to_matmul(p['down_w']),
                 ((0, 0), (0, Cp - Cout))).astype(cdt)      # (k*k*Cin, Cp)
    y2d = convpool_matmul(x2d, wd, out_dtype=cdt)           # (B*Ho*Wo, Cp)

    # 1-pixel zero spatial halo; the residual is read from its interior in-kernel.
    yp = jnp.pad(y2d.reshape(B, Ho, Wo, Cp), ((0, 0), (1, 1), (1, 1), (0, 0)))

    # --- Residual_Block: both 3x3 convs + BN + skip + ReLU in ONE kernel ------
    w1t, s1 = _fold_bn_into_conv(p['w1'], p['b1'], p['g1'], p['be1'],
                                 p['m1'], p['v1'], Cp, eps)
    w2t, s2 = _fold_bn_into_conv(p['w2'], p['b2'], p['g2'], p['be2'],
                                 p['m2'], p['v2'], Cp, eps)
    z = residual_block_fused(yp, w1t.astype(cdt), s1, w2t.astype(cdt), s2,
                             out_dtype=x_nchw.dtype)        # (B, Ho, Wo, Cp)

    # drop the padded channels (kept exactly 0 throughout), back to NCHW
    return jnp.transpose(z[..., :Cout], (0, 3, 1, 2))


# ---------------------------------------------------------------------------
# Parameters (deterministic synthetic init, PyTorch-style fan-in bounds)
# ---------------------------------------------------------------------------
def init_resnet_down_params(key, in_channel, out_channel, down_factor=2,
                            dtype=jnp.float32):
    k = down_factor
    keys = jax.random.split(key, 16)

    def uni(kk, shape, fan_in):
        bound = 1.0 / (fan_in ** 0.5)
        return jax.random.uniform(kk, shape, dtype, -bound, bound)

    return {
        'down_w': uni(keys[0], (out_channel, in_channel, k, k), in_channel * k * k),
        'w1': uni(keys[1], (out_channel, out_channel, 3, 3), out_channel * 9),
        'b1': uni(keys[2], (out_channel,), out_channel * 9),
        'w2': uni(keys[3], (out_channel, out_channel, 3, 3), out_channel * 9),
        'b2': uni(keys[4], (out_channel,), out_channel * 9),
        'g1': 1.0 + 0.1 * jax.random.normal(keys[5], (out_channel,), dtype),
        'be1': 0.1 * jax.random.normal(keys[6], (out_channel,), dtype),
        'm1': 0.1 * jax.random.normal(keys[7], (out_channel,), dtype),
        'v1': 1.0 + 0.1 * jax.random.uniform(keys[8], (out_channel,), dtype),
        'g2': 1.0 + 0.1 * jax.random.normal(keys[9], (out_channel,), dtype),
        'be2': 0.1 * jax.random.normal(keys[10], (out_channel,), dtype),
        'm2': 0.1 * jax.random.normal(keys[11], (out_channel,), dtype),
        'v2': 1.0 + 0.1 * jax.random.uniform(keys[12], (out_channel,), dtype),
    }


# ---------------------------------------------------------------------------
# Pure-JAX reference (same inference-mode BN semantics)
# ---------------------------------------------------------------------------
def ref_resnet_down(x, p, *, down_factor=2, eps=1e-5):
    dn = ('NCHW', 'OIHW', 'NCHW')

    def conv(a, w, s, pad):
        return jax.lax.conv_general_dilated(
            a, w, window_strides=(s, s), padding=pad, dimension_numbers=dn,
            precision=jax.lax.Precision.HIGHEST)

    bcast = lambda v: v[None, :, None, None]

    def bn(t, g, b, m, v):
        return bcast(g) * (t - bcast(m)) / jnp.sqrt(bcast(v) + eps) + bcast(b)

    y = conv(x, p['down_w'], down_factor, 'VALID')
    t = conv(y, p['w1'], 1, ((1, 1), (1, 1))) + bcast(p['b1'])
    t = jax.nn.relu(bn(t, p['g1'], p['be1'], p['m1'], p['v1']))
    z = conv(t, p['w2'], 1, ((1, 1), (1, 1))) + bcast(p['b2'])
    z = bn(z, p['g2'], p['be2'], p['m2'], p['v2'])
    return jax.nn.relu(z + y)


if __name__ == "__main__":
    key = jax.random.PRNGKey(0)
    kx, kp = jax.random.split(key)

    batch, in_channel, out_channel, spatial, down_factor = 2, 4, 8, 16, 2
    x = jax.random.normal(kx, (batch, in_channel, spatial, spatial), jnp.float32)
    params = init_resnet_down_params(kp, in_channel, out_channel, down_factor)

    ref = ref_resnet_down(x, params, down_factor=down_factor)

    # f32 compute path — tightened tolerance (covers MXU pass decomposition vs.
    # XLA conv; any structural bug would show O(1) error).
    out_f32 = jax.block_until_ready(
        resnet_down_forward(x, params, down_factor=down_factor,
                            compute_dtype=jnp.float32))
    assert out_f32.shape == ref.shape, (out_f32.shape, ref.shape)
    err32 = float(jnp.max(jnp.abs(out_f32 - ref)))
    assert jnp.allclose(out_f32, ref, atol=1e-2, rtol=1e-2), \
        f"f32 mismatch, max abs err={err32}"

    # default bf16 compute path (bf16 MXU operands, bf16-stored intermediates).
    out_bf16 = jax.block_until_ready(
        resnet_down_forward(x, params, down_factor=down_factor))
    err16 = float(jnp.max(jnp.abs(out_bf16 - ref)))
    assert jnp.allclose(out_bf16, ref, atol=4e-2, rtol=4e-2), \
        f"bf16 mismatch, max abs err={err16}"

    print("KERNEL_OK")
</pallas_src>

<mosaic_0001>
module attributes {stable_mosaic.version = 11 : i64} {
  func.func @_convpool_kernel(%arg0: i32, %arg1: memref<64x16xf32, #tpu.memory_space<vmem>>, %arg2: memref<16x128xf32, #tpu.memory_space<vmem>>, %arg3: memref<64x128xf32, #tpu.memory_space<vmem>>) attributes {dimension_semantics = [#tpu.dimension_semantics<parallel>], iteration_bounds = array<i64: 2>, scalar_prefetch = 0 : i64, scratch_operands = 0 : i64, tpu.core_type = #tpu.core_type<tc>, window_params = [{transform_indices = @transform_0, window_bounds = array<i64: 64, 16>}, {pipeline_mode = #tpu.pipeline_mode<synchronous>, transform_indices = @transform_1, window_bounds = array<i64: 16, 128>}, {transform_indices = @transform_2, window_bounds = array<i64: 64, 128>}]} {
    %c0 = arith.constant 0 : index
    %c0_0 = arith.constant 0 : index
    %0 = vector.load %arg1[%c0, %c0_0] : memref<64x16xf32, #tpu.memory_space<vmem>>, vector<64x16xf32>
    %c0_1 = arith.constant 0 : index
    %c0_2 = arith.constant 0 : index
    %1 = vector.load %arg2[%c0_1, %c0_2] : memref<16x128xf32, #tpu.memory_space<vmem>>, vector<16x128xf32>
    %cst = arith.constant dense<0.000000e+00> : vector<64x128xf32>
    %2 = tpu.matmul %0, %1, %cst {dimension_numbers = #tpu.dot_dimension_numbers<[1], [0], [0], [1], [0, 0, 1, 1], [], []>} : vector<64x16xf32>, vector<16x128xf32>, vector<64x128xf32> -> vector<64x128xf32>
    %c0_3 = arith.constant 0 : index
    %c0_4 = arith.constant 0 : index
    %3 = vector.load %arg3[%c0_3, %c0_4] : memref<64x128xf32, #tpu.memory_space<vmem>>, vector<64x128xf32>
    tpu.vector_store %arg3[%c0_3, %c0_4], %2 {strides = array<i32>} : memref<64x128xf32, #tpu.memory_space<vmem>>, vector<64x128xf32>,
    return
  }
  func.func @transform_0(%arg0: i32) -> (i32, i32) {
    %c0_i32 = arith.constant 0 : i32
    %c0_i32_0 = arith.constant 0 : i32
    return %arg0, %c0_i32 : i32, i32
  }
  func.func @transform_1(%arg0: i32) -> (i32, i32) {
    %c0_i32 = arith.constant 0 : i32
    %c0_i32_0 = arith.constant 0 : i32
    %c0_i32_1 = arith.constant 0 : i32
    return %c0_i32, %c0_i32_0 : i32, i32
  }
  func.func @transform_2(%arg0: i32) -> (i32, i32) {
    %c0_i32 = arith.constant 0 : i32
    %c0_i32_0 = arith.constant 0 : i32
    return %arg0, %c0_i32 : i32, i32
  }
}

</mosaic_0001>

<bundles_post_ra>
// kernel: tpu_custom_call.1
= control target key start
LH: loop header
LB: loop body
LE: loop exit
PB: predicated region body
PF: predicated region fallthrough
CT: control target
= control target key end

     0   :  { %7 = vsyncpa [#allocation3], 0  ;;  %s554_s0 = inlined_call_operand.vmem [shape: f32[128,16], index: 0, kind: input, shape index: {}]   ;;  %s555_s1 = inlined_call_operand.vmem [shape: f32[16,128], index: 1, kind: input, shape index: {}]   ;;  %s556_s2 = inlined_call_operand.hbm [shape: f32[128,128], index: 2, kind: output, shape index: {}]  }
   0x1   :  { %9 = vsyncpa [#allocation3 + $0x1], 0  ;;  %s456_s9 = smov 0   ;;  %s458_s10 = smov 0  }
   0x2   :  { %s460_s11 = smov 0   ;;  %s462_s12 = smov 0  }
   0x3 LB: > { %s477_s13 = sadd.s32 4294967295, %s437_s12   ;;  %s307_s14 = sadd.s32 4294967294, %s437_s12   ;;  %s437_s12 = sphi %s462_s12, %s562_s12   ;;  %s433_s11 = sphi %s460_s11, %s561_s11   ;;  %s429_s10 = sphi %s458_s10, %s560_s10   ;;  %s425_s9 = sphi %s456_s9, %s559_s9  }
   0x4   : > { %s481_s15 = sadd.s32 1, %s437_s12   ;;  %s69_s16 = sadd.s32 1, %s433_s11 }
   0x5   : > { %s66_s17 = ssub.s32 %s437_s12, %s481_s15  ;;  %p79_p0 = scmp.ne.s32.totalorder %s433_s11, %s429_s10 }
   0x6   : > { %p67_p1 = scmp.eq.s32.totalorder %s66_s17, 0  ;;  %p80_p2 = scmp.eq.s32.totalorder %s477_s13, 1 }
   0x7   : > { %p85_p3 = scmp.ne.s32.totalorder %s429_s10, %s425_s9  ;;  %p86_p4 = scmp.eq.s32.totalorder %s307_s14, 1 }
   0x8   : > { %s492_s18 = scalar_select %p67_p1, %s433_s11, %s69_s16  }
   0x9   : > { %p494_p5 = por %p80_p2, %p79_p0  ;;  %p498_p6 = por %p86_p4, %p85_p3 }
   0xa   : > { %p310_p7 = scmp.ge.s32.totalorder %s437_s12, 1  ;;  %p116_p8 = scmp.lt.s32.totalorder %s437_s12, 3 }
   0xc   : > { %p117_p9 = pnand %p310_p7, %p116_p8 }
   0xd   : > { %s312_s25 = sshll.u32 (!%p117_p9), %s477_s13, 3  ;;  %s135_s30 = sand.u32 (!%p117_p9), 1, %s429_s10  }
   0xe   : > { %120 = sbr.rel (%p117_p9) target bundleno = 169 (0xa9), region = 28  ;;  %p139_p10 = scmp.lt.s32.totalorder (!%p117_p9), %s312_s25, 15 }
   0xf   : > { %s311_s3 = sshll.u32 (!%p117_p9), %s135_s30, 6  ;;  %s327_s5 = sshll.u32 (!%p117_p9), %s477_s13, 6 }
  0x10   : > { %s137_s4 = scalar_lea.vmem (!%p117_p9), [#allocation2], %s311_s3  ;;  %s241_s8 = scalar_lea.hbm (!%p117_p9), %s556_s2, %s327_s5 }
  0x11   : > { %s242_s14 = sshll.u32 (!%p117_p9), %s137_s4, 4  ;;  %s244_s16 = sshll.u32 (!%p117_p9), %s241_s8, 4  ;;  %s243_s14 = int_to_ptr.vmem [resolvable:$true] %s242_s14  ;;  %s245_s16 = int_to_ptr.hbm [resolvable:$true] %s244_s16 }
  0x12   : > { %s230_s13 = scalar_lea.sflag (!%p117_p9), [#allocation3], %s135_s30  ;;  %s389_s17 = sshra.s32 (!%p117_p9), %s245_s16, 4  ;;  %s390_s17 = int_to_ptr.hbm [resolvable:$true] %s389_s17 }
  0x13   : > { %v154_v0 = vld [vmem:[%s555_s1 + $0x8] sm:$0xff]  ;;  %v153_v1 = vld [vmem:[%s555_s1] sm:$0xff]  ;;  %s564_s25 = smov (!%p139_p10, %s312_s25), 15  ;;  %vm155_vm0 = vcmask 130048   ;;  %s391_s21 = scalar_lea.hbm %s390_s17, 64 }
  0x14   : > { %329 = vmatpush.msra.mxu2 %v154_v0  ;;  %330 = vmatpush.msra.mxu3 %v154_v0  ;;  %s313_s26 = sshll.u32 %s564_s25, 3  ;;  %p392_p11 = scmp.ne.s32.totalorder %s390_s17, %s391_s21 }
  0x15   : > { %194 = vmatpush.msra.mxu0 %v154_v0  ;;  %328 = vmatpush.msra.mxu1 %v154_v0  ;;  %s142_s29 = scalar_lea.vmem %s554_s0, %s313_s26  ;;  %s395_s24 = scalar_lea.hbm %s556_s2, 128 }
  0x16   : > { %332 = vmatpush.msra.mxu2 %v153_v1  ;;  %333 = vmatpush.msra.mxu3 %v153_v1  ;;  %v149_v2 = vld [vmem:[%s142_s29 + $0x20] sm:$0xff]  ;;  %v151_v3 = vld [vmem:[%s142_s29 + $0x30] sm:$0xff]  ;;  %v150_v6 = vld [vmem:[%s142_s29 + $0x28] sm:$0xff]  ;;  %p393_p12 = pnand %p392_p11, %p494_p5  ;;  %p396_p0 = scmp.lt.s32.totalorder %s390_s17, %s556_s2 }
  0x17   : > { %195 = vmatpush.msra.mxu0 %v153_v1  ;;  %331 = vmatpush.msra.mxu1 %v153_v1  ;;  %v145_v4 = vld [vmem:[%s142_s29] sm:$0xff]  ;;  %v147_v5 = vld [vmem:[%s142_s29 + $0x10] sm:$0xff]  ;;  %v152_v7 = vld [vmem:[%s142_s29 + $0x38] sm:$0xff]  ;;  %p397_p1 = scmp.lt.s32.totalorder %s395_s24, %s391_s21 }
  0x18   : > { %318 = vmatmul.msk.f32.vlgmr.msra.gmra.mxu2 %vm155_vm0, %v149_v2  ;;  %320 = vmatmul.msk.f32.vlgmr.msra.gmra.mxu3 %vm155_vm0, %v151_v3  ;;  %v146_v8 = vld [vmem:[%s142_s29 + $0x8] sm:$0xff]  ;;  %v148_v9 = vld [vmem:[%s142_s29 + $0x18] sm:$0xff]  ;;  %p394_p13 = pneg %p393_p12 }
  0x19   : > { %314 = vmatmul.msk.f32.vlgmr.msra.gmra.mxu0 %vm155_vm0, %v145_v4  ;;  %316 = vmatmul.msk.f32.vlgmr.msra.gmra.mxu1 %vm155_vm0, %v147_v5  ;;  %p398_p2 = por %p397_p1, %p396_p0 }
  0x1b   : > { %p399_p3 = pnand %p398_p2, %p394_p13 }
  0x20   : > { %319 = vmatmul.msk.f32.gmra.mxu2 %vm155_vm0, %v150_v6  ;;  %321 = vmatmul.msk.f32.gmra.mxu3 %vm155_vm0, %v152_v7 }
  0x21   : > { %315 = vmatmul.msk.f32.gmra.mxu0 %vm155_vm0, %v146_v8  ;;  %317 = vmatmul.msk.f32.gmra.mxu1 %vm155_vm0, %v148_v9 }
  0x96   : > { %v197_v10 = vpop.f32.mrf.mxu0  ;;  %v203_v11 = vpop.f32.mrf.mxu1 }
  0x97   : > { %221 = vst [vmem:[%s137_s4] sm:$0xff] %v197_v10 }
  0x98   : > { %223 = vst [vmem:[%s137_s4 + $0x10] sm:$0xff] %v203_v11 }
  0x9b   : > { %v209_v12 = vpop.f32.mrf.mxu2  ;;  %v215_v13 = vpop.f32.mrf.mxu3 }
  0x9c   : > { %225 = vst [vmem:[%s137_s4 + $0x20] sm:$0xff] %v209_v12 }
  0x9d   : > { %227 = vst [vmem:[%s137_s4 + $0x30] sm:$0xff] %v215_v13 }
  0x9e   : > { %v200_v14 = vpop.f32.mrf.mxu0  ;;  %v206_v15 = vpop.f32.mrf.mxu1 }
  0x9f   : > { %222 = vst [vmem:[%s137_s4 + $0x8] sm:$0xff] %v200_v14 }
  0xa0   : > { %224 = vst [vmem:[%s137_s4 + $0x18] sm:$0xff] %v206_v15 }
  0xa3   : > { %v212_v16 = vpop.f32.mrf.mxu2  ;;  %v218_v17 = vpop.f32.mrf.mxu3 }
  0xa4   : > { %226 = vst [vmem:[%s137_s4 + $0x28] sm:$0xff] %v212_v16 }
  0xa5   : > { %228 = vst [vmem:[%s137_s4 + $0x38] sm:$0xff] %v218_v17 }
  0xa6   : > { %402 = shalt.err (!%p399_p3)
}
  0xa7   : > { %s439_s27 = smov 128   ;;  %s440_s28 = smov 8  }
  0xa8   : > { %334 = dma.vmem_to_hbm [thread:$0]  (%p494_p5), %s243_s14, 1024, %s245_s16, %s230_s13, %s439_s27, %s439_s27, %s440_s28  }
  0xa9 PF: > { %p340_p4 = scmp.ge.s32.totalorder %s437_s12, 2  ;;  %s259_s29 = sand.u32 1, %s425_s9  }
  0xaa   : > { %s260_s30 = scalar_lea.sflag [#allocation3], %s259_s29 }
  0xab   : > { %p337_p7 = pnand %p340_p4, %p498_p6 }
  0xad   : > { %p338_p8 = pneg %p337_p7 }
  0xaf   : > { %420 = dma.done.wait (%p338_p8), %s260_s30, 1024  }
  0xb0   : > { %422 = vsyncadd (%p338_p8), %s260_s30, 4294966272  ;;  %p12_p9 = scmp.ge.s32.totalorder %s481_s15, 4   ;;  %s559_s9 = smov %s429_s10 }
  0xb1   : > { %s560_s10 = smov %s433_s11  ;;  %s561_s11 = smov %s492_s18 }
  0xb2   : > { %s562_s12 = smov %s481_s15  ;;  %14 = sbr.rel (!%p12_p9) target bundleno = 3 (0x3), region = 63 }
  0xb7   :  { %266 = vsyncpa [#allocation3], 1 }
  0xb8   :  { %268 = vsyncpa [#allocation3 + $0x1], 1 }

</bundles_post_ra>
